<compile_context>
chip_gen: v7x
topology: tpu7x:2x2x1
jax: 0.10.0
libtpu: 0.0.40
codegen_flags: <defaults>
</compile_context>

<pallas_src>
import functools

import jax
import jax.numpy as jnp
from jax.experimental import pallas as pl
from jax.experimental.pallas import tpu as pltpu


def _round_up(x, m):
    return ((x + m - 1) // m) * m


# ----------------------------- Pallas kernel -------------------------------


def _decoder_step_kernel(num_layers, hsz, hp,
                         ids_ref, emb_ref, h_ref,
                         w_ih_ref, w_hh_ref, b_ref, w_out_ref, b_out_ref,
                         logits_ref, h_new_ref):
    """One GRU time step over `num_layers` stacked layers + output Linear.

    Padded / packed shapes (hp = round_up(H,128), gp = round_up(3H,128)):
      ids_ref   : (N,) int32            SMEM
      emb_ref   : (V_emb, dx) f32       VMEM, dx = max(round_up(E,128), hp)
      h_ref     : (L, N, hp) f32
      w_ih_ref  : (L, dx, gp) bf16      gates packed (r|z|n) in lanes [0:3H]
      w_hh_ref  : (L, hp, gp) bf16
      b_ref     : (L, 2, gp) f32        [:, 0] = b_ih, [:, 1] = b_hh
      w_out_ref : (hp, vp) bf16 ; b_out_ref : (1, vp) f32
      logits_ref: (N, vp) f32 ; h_new_ref : (L, N, hp) f32
    """
    n = h_ref.shape[1]
    v_emb = emb_ref.shape[0]

    # Embedding gather straight from VMEM: one dynamic-slice row read per id.
    rows = []
    for i in range(n):
        idx = jnp.maximum(jnp.minimum(ids_ref[i], v_emb - 1), 0)  # clamp (no VMEM bounds check)
        rows.append(emb_ref[pl.ds(idx, 1), :])
    x = jnp.concatenate(rows, axis=0)                    # (N, dx) f32
    x = jnp.maximum(x, 0.0).astype(jnp.bfloat16)         # relu(embedding), bf16 matmul operand

    # Hoisted zero block used to re-pad h_new to hp lanes each layer.
    pad_cols = jnp.zeros((n, hp - hsz), jnp.float32) if hp > hsz else None

    for layer in range(num_layers):
        h_prev = h_ref[layer]                            # (N, hp) f32
        w_ih = w_ih_ref[layer]                           # (dx, gp) bf16
        if x.shape[-1] < w_ih.shape[0]:                  # static width match (no x re-pad)
            w_ih = w_ih[: x.shape[-1]]
        b = b_ref[layer]                                 # (2, gp) f32

        gi = jnp.dot(x, w_ih, preferred_element_type=jnp.float32) + b[0:1]
        gh = jnp.dot(h_prev.astype(jnp.bfloat16), w_hh_ref[layer],
                     preferred_element_type=jnp.float32) + b[1:2]

        # Packed gate slices (r|z|n) at H-lane offsets — PyTorch GRU order.
        r = jax.nn.sigmoid(gi[:, 0:hsz] + gh[:, 0:hsz])
        z = jax.nn.sigmoid(gi[:, hsz:2 * hsz] + gh[:, hsz:2 * hsz])
        c = jnp.tanh(gi[:, 2 * hsz:3 * hsz] + r * gh[:, 2 * hsz:3 * hsz])
        h_new = (1.0 - z) * c + z * h_prev[:, :hsz]      # (N, H) f32

        h_full = (h_new if pad_cols is None
                  else jnp.concatenate([h_new, pad_cols], axis=-1))
        h_new_ref[layer] = h_full                        # padded columns == 0 by construction
        x = h_full.astype(jnp.bfloat16)
        # TODO(synk): inter-layer dropout (args.dropout) omitted — eval-mode semantics.

    logits_ref[...] = (
        jnp.dot(x, w_out_ref[...], preferred_element_type=jnp.float32)
        + b_out_ref[...])


# --------------------------- one-time param packing --------------------------


def pack_params(params):
    """One-time layout transformation: pack the 3 GRU gates contiguously,
    pad each matmul lane dim once to a multiple of 128, stack per-layer
    weights, and store matmul operands in bf16 (biases stay f32)."""
    emb = params["embedding"]                  # (V_emb, E) f32
    out_w = params["out_w"]                    # (H, V)
    out_b = params["out_b"]                    # (1, V)
    num_layers = len(params["w_ih"])
    E = emb.shape[1]
    H = out_w.shape[0]
    V = out_w.shape[1]
    hp = _round_up(H, 128)
    dx = max(_round_up(E, 128), hp)
    gp = _round_up(3 * H, 128)
    vp = _round_up(V, 128)

    def pad2(x, rows, cols):
        return jnp.pad(x, ((0, rows - x.shape[0]), (0, cols - x.shape[1])))

    w_ih = jnp.stack([pad2(params["w_ih"][l], dx, gp) for l in range(num_layers)])
    w_hh = jnp.stack([pad2(params["w_hh"][l], hp, gp) for l in range(num_layers)])
    biases = jnp.stack([
        jnp.concatenate([pad2(params["b_ih"][l], 1, gp),
                         pad2(params["b_hh"][l], 1, gp)], axis=0)
        for l in range(num_layers)])           # (L, 2, gp) f32

    return {
        "emb": pad2(emb, emb.shape[0], dx),                    # (V_emb, dx) f32, VMEM-resident
        "w_ih": w_ih.astype(jnp.bfloat16),                     # (L, dx, gp)
        "w_hh": w_hh.astype(jnp.bfloat16),                     # (L, hp, gp)
        "biases": biases,                                      # (L, 2, gp) f32
        "out_w": pad2(out_w, hp, vp).astype(jnp.bfloat16),     # (hp, vp)
        "out_b": pad2(out_b, 1, vp),                           # (1, vp) f32
        "dims": (H, V, hp, dx, gp, vp),
    }


# ------------------------------ JAX wrappers ---------------------------------


def decoder_rnn_step_padded(ids, hidden_padded, packed):
    """One decode step in the padded domain: hidden stays (L, N, hp) so a
    multi-step decode loop pays the pad/slice XLA ops only once."""
    H, V, hp, dx, gp, vp = packed["dims"]
    num_layers, batch, _ = hidden_padded.shape

    vmem = pl.BlockSpec(memory_space=pltpu.MemorySpace.VMEM)
    smem = pl.BlockSpec(memory_space=pltpu.MemorySpace.SMEM)

    param_bytes = sum(int(packed[k].size) * packed[k].dtype.itemsize
                      for k in ("emb", "w_ih", "w_hh", "biases", "out_w", "out_b"))
    cost = pl.CostEstimate(
        flops=2 * batch * num_layers * (dx + hp) * gp + 2 * batch * hp * vp,
        transcendentals=batch * num_layers * 3 * H,
        bytes_accessed=param_bytes + 2 * int(hidden_padded.size) * 4 + batch * vp * 4,
    )

    return pl.pallas_call(
        functools.partial(_decoder_step_kernel, num_layers, H, hp),
        out_shape=(
            jax.ShapeDtypeStruct((batch, vp), jnp.float32),
            jax.ShapeDtypeStruct((num_layers, batch, hp), jnp.float32),
        ),
        in_specs=[smem, vmem, vmem, vmem, vmem, vmem, vmem, vmem],
        out_specs=(vmem, vmem),
        cost_estimate=cost,
    )(ids, packed["emb"], hidden_padded, packed["w_ih"], packed["w_hh"],
      packed["biases"], packed["out_w"], packed["out_b"])


def decoder_rnn_forward(input_ids, hidden, encoder_output, packed):
    """Mirrors DecoderRNN.forward. `encoder_output` is unused (as in PyTorch)."""
    del encoder_output
    num_layers, batch, hidden_size = hidden.shape
    H, V, hp, dx, gp, vp = packed["dims"]
    assert H == hidden_size

    ids = input_ids[0].astype(jnp.int32)                        # (N,)
    hidden_p = jnp.pad(hidden, ((0, 0), (0, 0), (0, hp - H)))   # (L, N, hp)
    logits_p, h_new_p = decoder_rnn_step_padded(ids, hidden_p, packed)

    # Module-level interface: slice the padding back off (a decode loop should
    # instead carry h_new_p and slice only once at the end).
    return logits_p[:, :V], h_new_p[:, :, :H], None, None


# --------------------------- param construction -----------------------------


def init_params(key, vocab, word_embed, hidden_size, num_layers):
    keys = jax.random.split(key, 3 + 4 * num_layers)
    k = 1.0 / jnp.sqrt(hidden_size)

    params = {
        "embedding": jax.random.normal(keys[0], (vocab, word_embed), jnp.float32),
        "w_ih": [],
        "w_hh": [],
        "b_ih": [],
        "b_hh": [],
        # nn.Linear(hidden, vocab): stored transposed (H, V) for x @ W.
        "out_w": jax.random.uniform(keys[1], (hidden_size, vocab), jnp.float32, -k, k),
        "out_b": jax.random.uniform(keys[2], (1, vocab), jnp.float32, -k, k),
    }
    for layer in range(num_layers):
        in_dim = word_embed if layer == 0 else hidden_size
        kk = keys[3 + 4 * layer: 7 + 4 * layer]
        # PyTorch stores (3H, in); we keep the x @ W layout (in, 3H), gates (r|z|n).
        params["w_ih"].append(
            jax.random.uniform(kk[0], (in_dim, 3 * hidden_size), jnp.float32, -k, k))
        params["w_hh"].append(
            jax.random.uniform(kk[1], (hidden_size, 3 * hidden_size), jnp.float32, -k, k))
        params["b_ih"].append(
            jax.random.uniform(kk[2], (1, 3 * hidden_size), jnp.float32, -k, k))
        params["b_hh"].append(
            jax.random.uniform(kk[3], (1, 3 * hidden_size), jnp.float32, -k, k))
    return params


# ------------------------------ pure-JAX ref ---------------------------------


def decoder_rnn_reference(input_ids, hidden, params, matmul_dtype=jnp.float32):
    """Pure-JAX reference. matmul_dtype=bfloat16 mirrors the kernel's
    mixed-precision matmuls (bf16 operands, f32 accumulation)."""
    def mm(a, w):
        return jnp.dot(a.astype(matmul_dtype), w.astype(matmul_dtype),
                       preferred_element_type=jnp.float32)

    x = jnp.maximum(jnp.take(params["embedding"], input_ids[0], axis=0), 0.0)
    hsz = hidden.shape[-1]
    new_h = []
    for layer in range(hidden.shape[0]):
        h_prev = hidden[layer]
        gi = mm(x, params["w_ih"][layer]) + params["b_ih"][layer]
        gh = mm(h_prev, params["w_hh"][layer]) + params["b_hh"][layer]
        r = jax.nn.sigmoid(gi[:, :hsz] + gh[:, :hsz])
        z = jax.nn.sigmoid(gi[:, hsz:2 * hsz] + gh[:, hsz:2 * hsz])
        n = jnp.tanh(gi[:, 2 * hsz:] + r * gh[:, 2 * hsz:])
        h_new = (1.0 - z) * n + z * h_prev
        new_h.append(h_new)
        x = h_new
    logits = mm(x, params["out_w"]) + params["out_b"]
    return logits, jnp.stack(new_h, axis=0)


# ---------------------------------- main -------------------------------------


if __name__ == "__main__":
    # Small shapes implied by the module: N=8, hidden=32, word_embed=32,
    # vocab=64, num_gru_layers=2, max_ingr=5.
    VOCAB = 64
    WORD_EMBED = 32
    HIDDEN = 32
    NUM_LAYERS = 2
    BATCH = 8
    MAX_INGR = 5

    root = jax.random.PRNGKey(0)
    k_params, k_in, k_hid, k_enc = jax.random.split(root, 4)

    params = init_params(k_params, VOCAB, WORD_EMBED, HIDDEN, NUM_LAYERS)
    packed = pack_params(params)   # one-time packed / padded / bf16 weight layout

    input_ids = jax.random.randint(k_in, (1, BATCH), 0, VOCAB, dtype=jnp.int32)
    hidden = jax.random.normal(k_hid, (NUM_LAYERS, BATCH, HIDDEN), jnp.float32)
    encoder_output = jax.random.normal(k_enc, (MAX_INGR, BATCH, 2 * HIDDEN), jnp.float32)

    logits, new_hidden, _, _ = decoder_rnn_forward(input_ids, hidden, encoder_output, packed)
    jax.block_until_ready((logits, new_hidden))

    assert logits.shape == (BATCH, VOCAB)
    assert new_hidden.shape == (NUM_LAYERS, BATCH, HIDDEN)

    # Tight check vs a reference that mirrors the kernel's bf16-operand matmuls.
    mx_logits, mx_hidden = decoder_rnn_reference(input_ids, hidden, params,
                                                 matmul_dtype=jnp.bfloat16)
    assert jnp.allclose(logits, mx_logits, atol=2e-3, rtol=2e-3)
    assert jnp.allclose(new_hidden, mx_hidden, atol=2e-3, rtol=2e-3)

    # Loose check vs the pure-f32 module semantics (bf16 weight storage only
    # perturbs results at the ~1e-2 absolute level at these scales).
    f32_logits, f32_hidden = decoder_rnn_reference(input_ids, hidden, params)
    assert jnp.allclose(logits, f32_logits, atol=5e-2, rtol=5e-2)
    assert jnp.allclose(new_hidden, f32_hidden, atol=5e-2, rtol=5e-2)

    print("KERNEL_OK")
</pallas_src>

<mosaic_0001>
module attributes {stable_mosaic.version = 11 : i64} {
  func.func @_decoder_step_kernel(%arg0: memref<8xi32, #tpu.memory_space<smem>>, %arg1: memref<64x128xf32, #tpu.memory_space<vmem>>, %arg2: memref<2x8x128xf32, #tpu.memory_space<vmem>>, %arg3: memref<2x128x128xbf16, #tpu.memory_space<vmem>>, %arg4: memref<2x128x128xbf16, #tpu.memory_space<vmem>>, %arg5: memref<2x2x128xf32, #tpu.memory_space<vmem>>, %arg6: memref<128x128xbf16, #tpu.memory_space<vmem>>, %arg7: memref<1x128xf32, #tpu.memory_space<vmem>>, %arg8: memref<8x128xf32, #tpu.memory_space<vmem>>, %arg9: memref<2x8x128xf32, #tpu.memory_space<vmem>>) attributes {dimension_semantics = [], scalar_prefetch = 0 : i64, scratch_operands = 0 : i64, tpu.core_type = #tpu.core_type<tc>} {
    %c0 = arith.constant 0 : index
    %0 = memref.load %arg0[%c0] : memref<8xi32, #tpu.memory_space<smem>>
    %c63_i32 = arith.constant 63 : i32
    %1 = arith.minsi %0, %c63_i32 : i32
    %c0_i32 = arith.constant 0 : i32
    %2 = arith.maxsi %1, %c0_i32 : i32
    %3 = arith.index_cast %2 : i32 to index
    %c0_0 = arith.constant 0 : index
    %4 = vector.load %arg1[%3, %c0_0] : memref<64x128xf32, #tpu.memory_space<vmem>>, vector<1x128xf32>
    %c1 = arith.constant 1 : index
    %5 = memref.load %arg0[%c1] : memref<8xi32, #tpu.memory_space<smem>>
    %c63_i32_1 = arith.constant 63 : i32
    %6 = arith.minsi %5, %c63_i32_1 : i32
    %c0_i32_2 = arith.constant 0 : i32
    %7 = arith.maxsi %6, %c0_i32_2 : i32
    %8 = arith.index_cast %7 : i32 to index
    %c0_3 = arith.constant 0 : index
    %9 = vector.load %arg1[%8, %c0_3] : memref<64x128xf32, #tpu.memory_space<vmem>>, vector<1x128xf32>
    %c2 = arith.constant 2 : index
    %10 = memref.load %arg0[%c2] : memref<8xi32, #tpu.memory_space<smem>>
    %c63_i32_4 = arith.constant 63 : i32
    %11 = arith.minsi %10, %c63_i32_4 : i32
    %c0_i32_5 = arith.constant 0 : i32
    %12 = arith.maxsi %11, %c0_i32_5 : i32
    %13 = arith.index_cast %12 : i32 to index
    %c0_6 = arith.constant 0 : index
    %14 = vector.load %arg1[%13, %c0_6] : memref<64x128xf32, #tpu.memory_space<vmem>>, vector<1x128xf32>
    %c3 = arith.constant 3 : index
    %15 = memref.load %arg0[%c3] : memref<8xi32, #tpu.memory_space<smem>>
    %c63_i32_7 = arith.constant 63 : i32
    %16 = arith.minsi %15, %c63_i32_7 : i32
    %c0_i32_8 = arith.constant 0 : i32
    %17 = arith.maxsi %16, %c0_i32_8 : i32
    %18 = arith.index_cast %17 : i32 to index
    %c0_9 = arith.constant 0 : index
    %19 = vector.load %arg1[%18, %c0_9] : memref<64x128xf32, #tpu.memory_space<vmem>>, vector<1x128xf32>
    %c4 = arith.constant 4 : index
    %20 = memref.load %arg0[%c4] : memref<8xi32, #tpu.memory_space<smem>>
    %c63_i32_10 = arith.constant 63 : i32
    %21 = arith.minsi %20, %c63_i32_10 : i32
    %c0_i32_11 = arith.constant 0 : i32
    %22 = arith.maxsi %21, %c0_i32_11 : i32
    %23 = arith.index_cast %22 : i32 to index
    %c0_12 = arith.constant 0 : index
    %24 = vector.load %arg1[%23, %c0_12] : memref<64x128xf32, #tpu.memory_space<vmem>>, vector<1x128xf32>
    %c5 = arith.constant 5 : index
    %25 = memref.load %arg0[%c5] : memref<8xi32, #tpu.memory_space<smem>>
    %c63_i32_13 = arith.constant 63 : i32
    %26 = arith.minsi %25, %c63_i32_13 : i32
    %c0_i32_14 = arith.constant 0 : i32
    %27 = arith.maxsi %26, %c0_i32_14 : i32
    %28 = arith.index_cast %27 : i32 to index
    %c0_15 = arith.constant 0 : index
    %29 = vector.load %arg1[%28, %c0_15] : memref<64x128xf32, #tpu.memory_space<vmem>>, vector<1x128xf32>
    %c6 = arith.constant 6 : index
    %30 = memref.load %arg0[%c6] : memref<8xi32, #tpu.memory_space<smem>>
    %c63_i32_16 = arith.constant 63 : i32
    %31 = arith.minsi %30, %c63_i32_16 : i32
    %c0_i32_17 = arith.constant 0 : i32
    %32 = arith.maxsi %31, %c0_i32_17 : i32
    %33 = arith.index_cast %32 : i32 to index
    %c0_18 = arith.constant 0 : index
    %34 = vector.load %arg1[%33, %c0_18] : memref<64x128xf32, #tpu.memory_space<vmem>>, vector<1x128xf32>
    %c7 = arith.constant 7 : index
    %35 = memref.load %arg0[%c7] : memref<8xi32, #tpu.memory_space<smem>>
    %c63_i32_19 = arith.constant 63 : i32
    %36 = arith.minsi %35, %c63_i32_19 : i32
    %c0_i32_20 = arith.constant 0 : i32
    %37 = arith.maxsi %36, %c0_i32_20 : i32
    %38 = arith.index_cast %37 : i32 to index
    %c0_21 = arith.constant 0 : index
    %39 = vector.load %arg1[%38, %c0_21] : memref<64x128xf32, #tpu.memory_space<vmem>>, vector<1x128xf32>
    %40 = tpu.concatenate %4, %9, %14, %19, %24, %29, %34, %39 in 0 : vector<1x128xf32>, vector<1x128xf32>, vector<1x128xf32>, vector<1x128xf32>, vector<1x128xf32>, vector<1x128xf32>, vector<1x128xf32>, vector<1x128xf32> -> vector<8x128xf32>
    %cst = arith.constant 0.000000e+00 : f32
    %41 = vector.broadcast %cst : f32 to vector<8x128xf32>
    %42 = arith.maximumf %40, %41 : vector<8x128xf32>
    %43 = arith.truncf %42 : vector<8x128xf32> to vector<8x128xbf16>
    %cst_22 = arith.constant 0.000000e+00 : f32
    %44 = vector.broadcast %cst_22 : f32 to vector<8x96xf32>
    %c0_23 = arith.constant 0 : index
    %c0_24 = arith.constant 0 : index
    %c0_25 = arith.constant 0 : index
    %45 = vector.load %arg2[%c0_23, %c0_24, %c0_25] : memref<2x8x128xf32, #tpu.memory_space<vmem>>, vector<1x8x128xf32>
    %46 = vector.shape_cast %45 : vector<1x8x128xf32> to vector<8x128xf32>
    %c0_26 = arith.constant 0 : index
    %c0_27 = arith.constant 0 : index
    %c0_28 = arith.constant 0 : index
    %47 = vector.load %arg3[%c0_26, %c0_27, %c0_28] : memref<2x128x128xbf16, #tpu.memory_space<vmem>>, vector<1x128x128xbf16>
    %48 = vector.shape_cast %47 : vector<1x128x128xbf16> to vector<128x128xbf16>
    %c0_29 = arith.constant 0 : index
    %c0_30 = arith.constant 0 : index
    %c0_31 = arith.constant 0 : index
    %49 = vector.load %arg5[%c0_29, %c0_30, %c0_31] : memref<2x2x128xf32, #tpu.memory_space<vmem>>, vector<1x2x128xf32>
    %50 = vector.shape_cast %49 : vector<1x2x128xf32> to vector<2x128xf32>
    %cst_32 = arith.constant dense<0.000000e+00> : vector<8x128xf32>
    %51 = tpu.matmul %43, %48, %cst_32 {dimension_numbers = #tpu.dot_dimension_numbers<[1], [0], [0], [1], [0, 0, 1, 1], [], []>} : vector<8x128xbf16>, vector<128x128xbf16>, vector<8x128xf32> -> vector<8x128xf32>
    %52 = vector.extract_strided_slice %50 {offsets = [0, 0], sizes = [1, 128], strides = [1, 1]} : vector<2x128xf32> to vector<1x128xf32>
    %53 = vector.broadcast %52 : vector<1x128xf32> to vector<8x128xf32>
    %54 = arith.addf %51, %53 : vector<8x128xf32>
    %55 = arith.truncf %46 : vector<8x128xf32> to vector<8x128xbf16>
    %c0_33 = arith.constant 0 : index
    %c0_34 = arith.constant 0 : index
    %c0_35 = arith.constant 0 : index
    %56 = vector.load %arg4[%c0_33, %c0_34, %c0_35] : memref<2x128x128xbf16, #tpu.memory_space<vmem>>, vector<1x128x128xbf16>
    %57 = vector.shape_cast %56 : vector<1x128x128xbf16> to vector<128x128xbf16>
    %cst_36 = arith.constant dense<0.000000e+00> : vector<8x128xf32>
    %58 = tpu.matmul %55, %57, %cst_36 {dimension_numbers = #tpu.dot_dimension_numbers<[1], [0], [0], [1], [0, 0, 1, 1], [], []>} : vector<8x128xbf16>, vector<128x128xbf16>, vector<8x128xf32> -> vector<8x128xf32>
    %59 = vector.extract_strided_slice %50 {offsets = [1, 0], sizes = [1, 128], strides = [1, 1]} : vector<2x128xf32> to vector<1x128xf32>
    %60 = vector.broadcast %59 : vector<1x128xf32> to vector<8x128xf32>
    %61 = arith.addf %58, %60 : vector<8x128xf32>
    %62 = vector.extract_strided_slice %54 {offsets = [0, 0], sizes = [8, 32], strides = [1, 1]} : vector<8x128xf32> to vector<8x32xf32>
    %63 = vector.extract_strided_slice %61 {offsets = [0, 0], sizes = [8, 32], strides = [1, 1]} : vector<8x128xf32> to vector<8x32xf32>
    %64 = arith.addf %62, %63 : vector<8x32xf32>
    %65 = arith.negf %64 : vector<8x32xf32>
    %66 = math.exp %65 : vector<8x32xf32>
    %cst_37 = arith.constant 1.000000e+00 : f32
    %67 = vector.broadcast %cst_37 : f32 to vector<8x32xf32>
    %68 = arith.addf %67, %66 : vector<8x32xf32>
    %69 = arith.divf %67, %68 : vector<8x32xf32>
    %70 = vector.extract_strided_slice %54 {offsets = [0, 32], sizes = [8, 32], strides = [1, 1]} : vector<8x128xf32> to vector<8x32xf32>
    %71 = vector.extract_strided_slice %61 {offsets = [0, 32], sizes = [8, 32], strides = [1, 1]} : vector<8x128xf32> to vector<8x32xf32>
    %72 = arith.addf %70, %71 : vector<8x32xf32>
    %73 = arith.negf %72 : vector<8x32xf32>
    %74 = math.exp %73 : vector<8x32xf32>
    %cst_38 = arith.constant 1.000000e+00 : f32
    %75 = vector.broadcast %cst_38 : f32 to vector<8x32xf32>
    %76 = arith.addf %75, %74 : vector<8x32xf32>
    %77 = arith.divf %75, %76 : vector<8x32xf32>
    %78 = vector.extract_strided_slice %54 {offsets = [0, 64], sizes = [8, 32], strides = [1, 1]} : vector<8x128xf32> to vector<8x32xf32>
    %79 = vector.extract_strided_slice %61 {offsets = [0, 64], sizes = [8, 32], strides = [1, 1]} : vector<8x128xf32> to vector<8x32xf32>
    %80 = arith.mulf %69, %79 : vector<8x32xf32>
    %81 = arith.addf %78, %80 : vector<8x32xf32>
    %82 = math.tanh %81 : vector<8x32xf32>
    %cst_39 = arith.constant 1.000000e+00 : f32
    %83 = vector.broadcast %cst_39 : f32 to vector<8x32xf32>
    %84 = arith.subf %83, %77 : vector<8x32xf32>
    %85 = arith.mulf %84, %82 : vector<8x32xf32>
    %86 = vector.extract_strided_slice %46 {offsets = [0, 0], sizes = [8, 32], strides = [1, 1]} : vector<8x128xf32> to vector<8x32xf32>
    %87 = arith.mulf %77, %86 : vector<8x32xf32>
    %88 = arith.addf %85, %87 : vector<8x32xf32>
    %89 = tpu.concatenate %88, %44 in 1 : vector<8x32xf32>, vector<8x96xf32> -> vector<8x128xf32>
    %c0_40 = arith.constant 0 : index
    %c0_41 = arith.constant 0 : index
    %c0_42 = arith.constant 0 : index
    %90 = vector.load %arg9[%c0_40, %c0_41, %c0_42] : memref<2x8x128xf32, #tpu.memory_space<vmem>>, vector<1x8x128xf32>
    %91 = vector.shape_cast %90 : vector<1x8x128xf32> to vector<8x128xf32>
    %92 = vector.shape_cast %89 : vector<8x128xf32> to vector<1x8x128xf32>
    tpu.vector_store %arg9[%c0_40, %c0_41, %c0_42], %92 {strides = array<i32>} : memref<2x8x128xf32, #tpu.memory_space<vmem>>, vector<1x8x128xf32>,
    %93 = arith.truncf %89 : vector<8x128xf32> to vector<8x128xbf16>
    %c1_43 = arith.constant 1 : index
    %c0_44 = arith.constant 0 : index
    %c0_45 = arith.constant 0 : index
    %94 = vector.load %arg2[%c1_43, %c0_44, %c0_45] : memref<2x8x128xf32, #tpu.memory_space<vmem>>, vector<1x8x128xf32>
    %95 = vector.shape_cast %94 : vector<1x8x128xf32> to vector<8x128xf32>
    %c1_46 = arith.constant 1 : index
    %c0_47 = arith.constant 0 : index
    %c0_48 = arith.constant 0 : index
    %96 = vector.load %arg3[%c1_46, %c0_47, %c0_48] : memref<2x128x128xbf16, #tpu.memory_space<vmem>>, vector<1x128x128xbf16>
    %97 = vector.shape_cast %96 : vector<1x128x128xbf16> to vector<128x128xbf16>
    %c1_49 = arith.constant 1 : index
    %c0_50 = arith.constant 0 : index
    %c0_51 = arith.constant 0 : index
    %98 = vector.load %arg5[%c1_49, %c0_50, %c0_51] : memref<2x2x128xf32, #tpu.memory_space<vmem>>, vector<1x2x128xf32>
    %99 = vector.shape_cast %98 : vector<1x2x128xf32> to vector<2x128xf32>
    %cst_52 = arith.constant dense<0.000000e+00> : vector<8x128xf32>
    %100 = tpu.matmul %93, %97, %cst_52 {dimension_numbers = #tpu.dot_dimension_numbers<[1], [0], [0], [1], [0, 0, 1, 1], [], []>} : vector<8x128xbf16>, vector<128x128xbf16>, vector<8x128xf32> -> vector<8x128xf32>
    %101 = vector.extract_strided_slice %99 {offsets = [0, 0], sizes = [1, 128], strides = [1, 1]} : vector<2x128xf32> to vector<1x128xf32>
    %102 = vector.broadcast %101 : vector<1x128xf32> to vector<8x128xf32>
    %103 = arith.addf %100, %102 : vector<8x128xf32>
    %104 = arith.truncf %95 : vector<8x128xf32> to vector<8x128xbf16>
    %c1_53 = arith.constant 1 : index
    %c0_54 = arith.constant 0 : index
    %c0_55 = arith.constant 0 : index
    %105 = vector.load %arg4[%c1_53, %c0_54, %c0_55] : memref<2x128x128xbf16, #tpu.memory_space<vmem>>, vector<1x128x128xbf16>
    %106 = vector.shape_cast %105 : vector<1x128x128xbf16> to vector<128x128xbf16>
    %cst_56 = arith.constant dense<0.000000e+00> : vector<8x128xf32>
    %107 = tpu.matmul %104, %106, %cst_56 {dimension_numbers = #tpu.dot_dimension_numbers<[1], [0], [0], [1], [0, 0, 1, 1], [], []>} : vector<8x128xbf16>, vector<128x128xbf16>, vector<8x128xf32> -> vector<8x128xf32>
    %108 = vector.extract_strided_slice %99 {offsets = [1, 0], sizes = [1, 128], strides = [1, 1]} : vector<2x128xf32> to vector<1x128xf32>
    %109 = vector.broadcast %108 : vector<1x128xf32> to vector<8x128xf32>
    %110 = arith.addf %107, %109 : vector<8x128xf32>
    %111 = vector.extract_strided_slice %103 {offsets = [0, 0], sizes = [8, 32], strides = [1, 1]} : vector<8x128xf32> to vector<8x32xf32>
    %112 = vector.extract_strided_slice %110 {offsets = [0, 0], sizes = [8, 32], strides = [1, 1]} : vector<8x128xf32> to vector<8x32xf32>
    %113 = arith.addf %111, %112 : vector<8x32xf32>
    %114 = arith.negf %113 : vector<8x32xf32>
    %115 = math.exp %114 : vector<8x32xf32>
    %cst_57 = arith.constant 1.000000e+00 : f32
    %116 = vector.broadcast %cst_57 : f32 to vector<8x32xf32>
    %117 = arith.addf %116, %115 : vector<8x32xf32>
    %118 = arith.divf %116, %117 : vector<8x32xf32>
    %119 = vector.extract_strided_slice %103 {offsets = [0, 32], sizes = [8, 32], strides = [1, 1]} : vector<8x128xf32> to vector<8x32xf32>
    %120 = vector.extract_strided_slice %110 {offsets = [0, 32], sizes = [8, 32], strides = [1, 1]} : vector<8x128xf32> to vector<8x32xf32>
    %121 = arith.addf %119, %120 : vector<8x32xf32>
    %122 = arith.negf %121 : vector<8x32xf32>
    %123 = math.exp %122 : vector<8x32xf32>
    %cst_58 = arith.constant 1.000000e+00 : f32
    %124 = vector.broadcast %cst_58 : f32 to vector<8x32xf32>
    %125 = arith.addf %124, %123 : vector<8x32xf32>
    %126 = arith.divf %124, %125 : vector<8x32xf32>
    %127 = vector.extract_strided_slice %103 {offsets = [0, 64], sizes = [8, 32], strides = [1, 1]} : vector<8x128xf32> to vector<8x32xf32>
    %128 = vector.extract_strided_slice %110 {offsets = [0, 64], sizes = [8, 32], strides = [1, 1]} : vector<8x128xf32> to vector<8x32xf32>
    %129 = arith.mulf %118, %128 : vector<8x32xf32>
    %130 = arith.addf %127, %129 : vector<8x32xf32>
    %131 = math.tanh %130 : vector<8x32xf32>
    %cst_59 = arith.constant 1.000000e+00 : f32
    %132 = vector.broadcast %cst_59 : f32 to vector<8x32xf32>
    %133 = arith.subf %132, %126 : vector<8x32xf32>
    %134 = arith.mulf %133, %131 : vector<8x32xf32>
    %135 = vector.extract_strided_slice %95 {offsets = [0, 0], sizes = [8, 32], strides = [1, 1]} : vector<8x128xf32> to vector<8x32xf32>
    %136 = arith.mulf %126, %135 : vector<8x32xf32>
    %137 = arith.addf %134, %136 : vector<8x32xf32>
    %138 = tpu.concatenate %137, %44 in 1 : vector<8x32xf32>, vector<8x96xf32> -> vector<8x128xf32>
    %c1_60 = arith.constant 1 : index
    %c0_61 = arith.constant 0 : index
    %c0_62 = arith.constant 0 : index
    %139 = vector.load %arg9[%c1_60, %c0_61, %c0_62] : memref<2x8x128xf32, #tpu.memory_space<vmem>>, vector<1x8x128xf32>
    %140 = vector.shape_cast %139 : vector<1x8x128xf32> to vector<8x128xf32>
    %141 = vector.shape_cast %138 : vector<8x128xf32> to vector<1x8x128xf32>
    tpu.vector_store %arg9[%c1_60, %c0_61, %c0_62], %141 {strides = array<i32>} : memref<2x8x128xf32, #tpu.memory_space<vmem>>, vector<1x8x128xf32>,
    %142 = arith.truncf %138 : vector<8x128xf32> to vector<8x128xbf16>
    %c0_63 = arith.constant 0 : index
    %c0_64 = arith.constant 0 : index
    %143 = vector.load %arg6[%c0_63, %c0_64] : memref<128x128xbf16, #tpu.memory_space<vmem>>, vector<128x128xbf16>
    %cst_65 = arith.constant dense<0.000000e+00> : vector<8x128xf32>
    %144 = tpu.matmul %142, %143, %cst_65 {dimension_numbers = #tpu.dot_dimension_numbers<[1], [0], [0], [1], [0, 0, 1, 1], [], []>} : vector<8x128xbf16>, vector<128x128xbf16>, vector<8x128xf32> -> vector<8x128xf32>
    %c0_66 = arith.constant 0 : index
    %c0_67 = arith.constant 0 : index
    %145 = vector.load %arg7[%c0_66, %c0_67] : memref<1x128xf32, #tpu.memory_space<vmem>>, vector<1x128xf32>
    %146 = vector.broadcast %145 : vector<1x128xf32> to vector<8x128xf32>
    %147 = arith.addf %144, %146 : vector<8x128xf32>
    %c0_68 = arith.constant 0 : index
    %c0_69 = arith.constant 0 : index
    %148 = vector.load %arg8[%c0_68, %c0_69] : memref<8x128xf32, #tpu.memory_space<vmem>>, vector<8x128xf32>
    tpu.vector_store %arg8[%c0_68, %c0_69], %147 {strides = array<i32>} : memref<8x128xf32, #tpu.memory_space<vmem>>, vector<8x128xf32>,
    return
  }
}

</mosaic_0001>

<bundles_post_ra>
// kernel: tpu_custom_call.1
= control target key start
LH: loop header
LB: loop body
LE: loop exit
PB: predicated region body
PF: predicated region fallthrough
CT: control target
= control target key end

     0   :  { %15 = vsyncpa [#allocation5], 0  ;;  %s1703_s0 = inlined_call_operand.hbm [shape: s32[8], index: 0, kind: input, shape index: {}]   ;;  %s1704_s1 = inlined_call_operand.hbm [shape: f32[64,128], index: 1, kind: input, shape index: {}]   ;;  %s1705_s2 = inlined_call_operand.hbm [shape: f32[2,8,128], index: 2, kind: input, shape index: {}]   ;;  %s1706_s3 = inlined_call_operand.hbm [shape: bf16[2,128,128], index: 3, kind: input, shape index: {}]   ;;  %s1707_s4 = inlined_call_operand.hbm [shape: bf16[2,128,128], index: 4, kind: input, shape index: {}]   ;;  %s1708_s5 = inlined_call_operand.vmem [shape: f32[2,2,128], index: 5, kind: input, shape index: {}]   ;;  %s1709_s6 = inlined_call_operand.hbm [shape: bf16[128,128], index: 6, kind: input, shape index: {}]   ;;  %s1710_s7 = inlined_call_operand.vmem [shape: f32[1,128], index: 7, kind: input, shape index: {}]   ;;  %s1711_s8 = inlined_call_operand.hbm [shape: f32[8,128], index: 8, kind: output, shape index: {0}]   ;;  %s1712_s9 = inlined_call_operand.hbm [shape: f32[2,8,128], index: 9, kind: output, shape index: {1}]  }
   0x1   :  { %16 = vsyncpa [#allocation3], 0 }
   0x2   :  { %17 = vsyncpa [#allocation8], 0 }
   0x3   :  { %18 = vsyncpa [#allocation11], 0 }
   0x4   :  { %19 = vsyncpa [#allocation4], 0 }
   0x5   :  { %20 = vsyncpa [#allocation15], 0  ;;  %s1380_s30 = smov [#allocation7]   ;;  %s1204_s13 = scalar_lea.hbm %s1705_s2, 256 }
   0x6   :  { %s46_s10 = sshll.u32 %s1380_s30, 4  ;;  %p1205_p0 = scmp.ne.s32.totalorder %s1705_s2, %s1204_s13  ;;  %s47_s10 = int_to_ptr.vmem [resolvable:$true] %s46_s10 }
   0x7   :  { %p1208_p1 = scmp.lt.u32.totalorder %s1204_s13, %s1705_s2 }
   0x9   :  { %p1210_p2 = pnand %p1208_p1, %p1205_p0 }
   0xb   :  { %1213 = shalt.err (!%p1210_p2)
}
   0xc   :  { %s1214_s18 = scalar_lea.vmem %s47_s10, 256  ;;  %p1219_p4 = scmp.lt.s32.totalorder %s47_s10, %s47_s10 }
   0xd   :  { %p1215_p3 = scmp.ne.s32.totalorder %s47_s10, %s1214_s18  ;;  %p1220_p5 = scmp.lt.s32.totalorder %s1214_s18, %s1214_s18 }
   0xf   :  { %p1221_p6 = por %p1220_p5, %p1219_p4 }
  0x11   :  { %p1222_p7 = pnand %p1221_p6, %p1215_p3 }
  0x13   :  { %1225 = shalt.err (!%p1222_p7)
}
  0x14   :  { %s1381_s19 = smov 128   ;;  %s1382_s20 = smov 8  }
  0x15   :  { %52 = dma.hbm_to_vmem [thread:$0]  %s1705_s2, 256, %s47_s10, [#allocation8], %s1381_s19, %s1381_s19, %s1382_s20  }
  0x16   :  { %s1383_s23 = smov [#allocation10]   ;;  %s1226_s27 = scalar_lea.hbm %s1707_s4, 2048 }
  0x17   :  { %s70_s24 = sshll.u32 %s1383_s23, 4  ;;  %p1227_p8 = scmp.ne.s32.totalorder %s1707_s4, %s1226_s27  ;;  %s71_s24 = int_to_ptr.vmem [resolvable:$true] %s70_s24 }
  0x18   :  { %p1230_p9 = scmp.lt.u32.totalorder %s1226_s27, %s1707_s4 }
  0x1a   :  { %p1232_p10 = pnand %p1230_p9, %p1227_p8 }
  0x1c   :  { %1235 = shalt.err (!%p1232_p10)
}
  0x1d   :  { %s1236_s12 = scalar_lea.vmem %s71_s24, 2048  ;;  %p1241_p12 = scmp.lt.s32.totalorder %s71_s24, %s71_s24 }
  0x1e   :  { %p1237_p11 = scmp.ne.s32.totalorder %s71_s24, %s1236_s12  ;;  %p1242_p13 = scmp.lt.s32.totalorder %s1236_s12, %s1236_s12 }
  0x20   :  { %p1243_p0 = por %p1242_p13, %p1241_p12 }
  0x22   :  { %p1244_p1 = pnand %p1243_p0, %p1237_p11 }
  0x24   :  { %1247 = shalt.err (!%p1244_p1)
}
  0x25   :  { %s1384_s2 = smov 64   ;;  %s1385_s10 = smov 4  }
  0x26   :  { %76 = dma.hbm_to_vmem [thread:$0]  %s1707_s4, 2048, %s71_s24, [#allocation11], %s1384_s2, %s1384_s2, %s1385_s10  }
  0x27   :  { %s1248_s17 = scalar_lea.hbm %s1703_s0, 16 }
  0x28   :  { %p1249_p2 = scmp.ne.s32.totalorder %s1703_s0, %s1248_s17  ;;  %p1252_p3 = scmp.lt.u32.totalorder %s1248_s17, %s1703_s0 }
  0x2a   :  { %p1254_p4 = pnand %p1252_p3, %p1249_p2 }
  0x2c   :  { %1257 = shalt.err (!%p1254_p4)
}
  0x2d   :  { %s1386_s25 = smov [#allocation2]   ;;  %s1387_s4 = smov [#allocation6]  }
  0x2e   :  { %28 = dma.hbm_to_smem %s1703_s0, 16, %s1386_s25, [#allocation5]  }
  0x2f   :  { %s34_s24 = sshll.u32 %s1387_s4, 4  ;;  %s1388_s28 = smov [#allocation9]   ;;  %s35_s24 = int_to_ptr.vmem [resolvable:$true] %s34_s24 }
  0x30   :  { %s58_s29 = sshll.u32 %s1388_s28, 4  ;;  %s1258_s12 = scalar_lea.hbm %s1704_s1, 1024  ;;  %s59_s29 = int_to_ptr.vmem [resolvable:$true] %s58_s29 }
  0x31   :  { %p1259_p5 = scmp.ne.s32.totalorder %s1704_s1, %s1258_s12  ;;  %p1262_p6 = scmp.lt.u32.totalorder %s1258_s12, %s1704_s1 }
  0x33   :  { %p1264_p7 = pnand %p1262_p6, %p1259_p5 }
  0x35   :  { %1267 = shalt.err (!%p1264_p7)
}
  0x36   :  { %s1268_s0 = scalar_lea.vmem %s35_s24, 1024  ;;  %p1273_p9 = scmp.lt.s32.totalorder %s35_s24, %s35_s24 }
  0x37   :  { %p1269_p8 = scmp.ne.s32.totalorder %s35_s24, %s1268_s0  ;;  %p1274_p10 = scmp.lt.s32.totalorder %s1268_s0, %s1268_s0 }
  0x39   :  { %p1275_p11 = por %p1274_p10, %p1273_p9 }
  0x3b   :  { %p1276_p12 = pnand %p1275_p11, %p1269_p8 }
  0x3d   :  { %1279 = shalt.err (!%p1276_p12)
}
  0x3e   :  { %40 = dma.hbm_to_vmem [thread:$0]  %s1704_s1, 1024, %s35_s24, [#allocation3], %s1381_s19, %s1381_s19, %s1382_s20  }
  0x3f   :  { %s1280_s23 = scalar_lea.hbm %s1706_s3, 2048 }
  0x40   :  { %p1281_p13 = scmp.ne.s32.totalorder %s1706_s3, %s1280_s23  ;;  %p1284_p0 = scmp.lt.u32.totalorder %s1280_s23, %s1706_s3 }
  0x42   :  { %p1286_p1 = pnand %p1284_p0, %p1281_p13 }
  0x44   :  { %1289 = shalt.err (!%p1286_p1)
}
  0x45   :  { %s1290_s28 = scalar_lea.vmem %s59_s29, 2048  ;;  %p1295_p3 = scmp.lt.s32.totalorder %s59_s29, %s59_s29 }
  0x46   :  { %p1291_p2 = scmp.ne.s32.totalorder %s59_s29, %s1290_s28  ;;  %p1296_p4 = scmp.lt.s32.totalorder %s1290_s28, %s1290_s28 }
  0x48   :  { %p1297_p5 = por %p1296_p4, %p1295_p3 }
  0x4a   :  { %p1298_p6 = pnand %p1297_p5, %p1291_p2 }
  0x4c   :  { %1301 = shalt.err (!%p1298_p6)
}
  0x4d   :  { %64 = dma.hbm_to_vmem [thread:$0]  %s1706_s3, 2048, %s59_s29, [#allocation8], %s1384_s2, %s1384_s2, %s1385_s10  }
  0x4e   :  { %s1389_s30 = smov [#allocation12]   ;;  %s1302_s14 = scalar_lea.hbm %s1709_s6, 1024 }
  0x4f   :  { %s84_s11 = sshll.u32 %s1389_s30, 4  ;;  %p1303_p7 = scmp.ne.s32.totalorder %s1709_s6, %s1302_s14  ;;  %s85_s11 = int_to_ptr.vmem [resolvable:$true] %s84_s11 }
  0x50   :  { %p1306_p8 = scmp.lt.u32.totalorder %s1302_s14, %s1709_s6 }
  0x52   :  { %p1308_p9 = pnand %p1306_p8, %p1303_p7 }
  0x54   :  { %1311 = shalt.err (!%p1308_p9)
}
  0x55   :  { %s1312_s18 = scalar_lea.vmem %s85_s11, 1024  ;;  %p1317_p11 = scmp.lt.s32.totalorder %s85_s11, %s85_s11 }
  0x56   :  { %p1313_p10 = scmp.ne.s32.totalorder %s85_s11, %s1312_s18  ;;  %p1318_p12 = scmp.lt.s32.totalorder %s1312_s18, %s1312_s18 }
  0x58   :  { %p1319_p13 = por %p1318_p12, %p1317_p11 }
  0x5a   :  { %p1320_p0 = pnand %p1319_p13, %p1313_p10 }
  0x5c   :  { %1323 = shalt.err (!%p1320_p0)
}
  0x5d   :  { %90 = dma.hbm_to_vmem [thread:$0]  %s1709_s6, 1024, %s85_s11, [#allocation11], %s1384_s2, %s1384_s2, %s1385_s10  }
  0x5e   :  { %1368 = dma.done.wait [#allocation5], 16  }
  0x5f   :  { %1369 = vsyncadd [#allocation5], 4294967280 }
  0x60   :  { %1370 = dma.done.wait [#allocation3], 1024  }
  0x61   :  { %1371 = vsyncadd [#allocation3], 4294966272 }
  0x62   :  { %1372 = dma.done.wait [#allocation8], 2304  }
  0x63   :  { %1373 = vsyncadd [#allocation8], 4294964992 }
  0x64   :  { %1374 = dma.done.wait [#allocation11], 3072  }
  0x65   :  { %1375 = vsyncadd [#allocation11], 4294964224 }
  0x66   :  { %111 = sfence }
  0x67   :  { %v1152_v0 = vld [vmem:[#allocation9] sm:$0xff]   ;;  %v1390_v1 = vmov 0.0   ;;  %v1154_v3 = vld [vmem:[#allocation9 + $0x8] sm:$0xff]   ;;  %vm1391_vm0 = vmmov 0   ;;  %v1156_v5 = vld [vmem:[#allocation9 + $0x10] sm:$0xff]   ;;  %s1547_s6 = sld [smem:[#allocation2]]  ;;  %v224_v43 = vlaneseq }
  0x68   :  { %1036 = vmatprep.subr.bf16.mxu0 %v1390_v1  ;;  %1056 = vmatprep.subr.bf16.mxu1 %v1390_v1  ;;  %v1153_v2 = vld [vmem:[#allocation10] sm:$0xff]   ;;  %v1155_v4 = vld [vmem:[#allocation10 + $0x8] sm:$0xff]   ;;  %v1157_v6 = vld [vmem:[#allocation10 + $0x10] sm:$0xff]   ;;  %s1549_s10 = sld [smem:[#allocation2 + $0x1]]  ;;  %s1551_s21 = sld [smem:[#allocation2 + $0x2]]  ;;  %vm190_vm1 = vcmask 1040384  }
  0x69   :  { %1037 = vmatpush3.bf16.msra.mxu0 %v1152_v0  ;;  %1052 = vmatprep.mubr.msk.bf16.mxu0 %vm1391_vm0, %v1390_v1  ;;  %v1158_v7 = vld [vmem:[#allocation9 + $0x18] sm:$0xff]   ;;  %v1160_v9 = vld [vmem:[#allocation9 + $0x20] sm:$0xff]   ;;  %v1162_v11 = vld [vmem:[#allocation9 + $0x28] sm:$0xff]   ;;  %s1553_s22 = sld [smem:[#allocation2 + $0x3]]  ;;  %s1555_s23 = sld [smem:[#allocation2 + $0x4]]  ;;  %vm192_vm2 = vcmask 1041408  }
  0x6a   :  { %1057 = vmatpush3.bf16.msra.mxu1 %v1153_v2  ;;  %1038 = vmatprep.subr.bf16.mxu0 %v1390_v1  ;;  %v1159_v8 = vld [vmem:[#allocation10 + $0x18] sm:$0xff]   ;;  %v1161_v10 = vld [vmem:[#allocation10 + $0x20] sm:$0xff]   ;;  %v1163_v12 = vld [vmem:[#allocation10 + $0x28] sm:$0xff]   ;;  %s1557_s25 = sld [smem:[#allocation2 + $0x5]]  ;;  %s1560_s26 = sld [smem:[#allocation2 + $0x6]]  ;;  %vm194_vm3 = vcmask 1042432  }
  0x6b   :  { %1058 = vmatprep.subr.bf16.mxu1 %v1390_v1  ;;  %1072 = vmatprep.mubr.msk.bf16.mxu1 %vm1391_vm0, %v1390_v1  ;;  %s1562_s27 = sld [smem:[#allocation2 + $0x7]]  ;;  %v1164_v13 = vld [vmem:[#allocation9 + $0x30] sm:$0xff]   ;;  %v1166_v15 = vld [vmem:[#allocation9 + $0x38] sm:$0xff]   ;;  %vm196_vm4 = vcmask 1043456   ;;  %vm198_vm5 = vcmask 1044480   ;;  %vm200_vm6 = vcmask 1045504  }
  0x6c   :  { %v1165_v14 = vld [vmem:[#allocation10 + $0x30] sm:$0xff]   ;;  %v1167_v16 = vld [vmem:[#allocation10 + $0x38] sm:$0xff]   ;;  %vm202_vm7 = vcmask 1046528   ;;  %v1603_v44 = vshrl.u32 %v224_v43, 7  ;;  %v223_v46 = vld [vmem:[%s1708_s5] sm:$0x3] }
  0x6d   :  { %1039 = vmatpush3.bf16.msra.mxu0 %v1154_v3  ;;  %p114_p1 = scmp.lt.s32.totalorder %s1547_s6, 63  ;;  %p878_p2 = scmp.gt.s32.totalorder %s1547_s6, 0  ;;  %v1574_v17 = vld [vmem:[#allocation7] sm:$0xff]  ;;  %vm459_vm8 = vcmask 261120  }
  0x6e   :  { %1059 = vmatpush3.bf16.msra.mxu1 %v1155_v4  ;;  %1040 = vmatprep.subr.bf16.mxu0 %v1390_v1  ;;  %p121_p3 = scmp.lt.s32.totalorder %s1549_s10, 63  ;;  %p884_p4 = scmp.gt.s32.totalorder %s1549_s10, 0  ;;  %v316_v19 = vpack.c.bf16 %v1574_v17, %v1574_v17  ;;  %v335_v45 = vsub.s32 1, %v1603_v44  ;;  %v226_v57 = vsub.s32 0, %v1603_v44  ;;  %vm1647_vm9 = vmpackc.low %vm459_vm8, %vm459_vm8 }
  0x6f   :  { %1060 = vmatprep.subr.bf16.mxu1 %v1390_v1  ;;  %s1716_s6 = smov (!%p114_p1, %s1547_s6), 63  ;;  %p128_p5 = scmp.lt.s32.totalorder %s1551_s21, 63 }
  0x70   :  { %s1718_s10 = smov (!%p121_p3, %s1549_s10), 63  ;;  %s1720_s6 = smov (!%p878_p2, %s1716_s6), 0  ;;  %v336_v47 = vrot.slane %v223_v46, %v335_v45  ;;  %v227_v58 = vrot.slane %v223_v46, %v226_v57 }
  0x71   :  { %1041 = vmatpush3.bf16.msra.mxu0 %v1156_v5  ;;  %s1722_s10 = smov (!%p884_p4, %s1718_s10), 0  ;;  %p890_p6 = scmp.gt.s32.totalorder %s1551_s21, 0 }
  0x72   :  { %1061 = vmatpush3.bf16.msra.mxu1 %v1157_v6  ;;  %1042 = vmatprep.subr.bf16.mxu0 %v1390_v1  ;;  %s125_s4 = scalar_lea.vmem [#allocation6], %s1722_s10  ;;  %s1724_s21 = smov (!%p128_p5, %s1551_s21), 63  ;;  %v1168_v6 = vld [vmem:[#allocation10 + $0x40] sm:$0xff]  }
  0x73   :  { %1062 = vmatprep.subr.bf16.mxu1 %v1390_v1  ;;  %v126_v18 = vld [vmem:[%s125_s4] sm:$0x1]  ;;  %p135_p7 = scmp.lt.s32.totalorder %s1553_s22, 63  ;;  %p896_p8 = scmp.gt.s32.totalorder %s1553_s22, 0 }
  0x74   :  { %s118_s28 = scalar_lea.vmem [#allocation6], %s1720_s6  ;;  %s1726_s21 = smov (!%p890_p6, %s1724_s21), 0  ;;  %v170_v21 = vrot.slane %v126_v18, 7  ;;  %v1180_v18 = vld [vmem:[#allocation9 + $0x60] sm:$0xff]  }
  0x75   :  { %1043 = vmatpush3.bf16.msra.mxu0 %v1158_v7  ;;  %v119_v20 = vld [vmem:[%s118_s28] sm:$0x1]  ;;  %s1728_s22 = smov (!%p135_p7, %s1553_s22), 63  ;;  %p142_p9 = scmp.lt.s32.totalorder %s1555_s23, 63 }
  0x76   :  { %1063 = vmatpush3.bf16.msra.mxu1 %v1159_v8  ;;  %1044 = vmatprep.subr.bf16.mxu0 %v1390_v1  ;;  %s132_s1 = scalar_lea.vmem [#allocation6], %s1726_s21  ;;  %s1730_s22 = smov (!%p896_p8, %s1728_s22), 0  ;;  %v191_v24 = vsel %vm190_vm1, %v119_v20, %v170_v21  ;;  %v1169_v7 = vld [vmem:[#allocation10 + $0x48] sm:$0xff]   ;;  %v1176_v8 = vld [vmem:[#allocation9 + $0x40] sm:$0xff]   ;;  %v1175_v20 = vld [vmem:[#allocation10 + $0x78] sm:$0xff]  }
  0x77   :  { %1064 = vmatprep.subr.bf16.mxu1 %v1390_v1  ;;  %v133_v22 = vld [vmem:[%s132_s1] sm:$0x1]  ;;  %s143_s24 = scalar_select %p142_p9, %s1555_s23, 63  ;;  %v464_v21 = vld [vmem:[#allocation7 + $0x8] sm:$0xff] }
  0x78   :  { %v173_v23 = vrot.slane %v133_v22, 6  ;;  %p902_p10 = scmp.gt.s32.totalorder %s1555_s23, 0  ;;  %s139_s30 = scalar_lea.vmem [#allocation6], %s1730_s22  ;;  %v1182_v22 = vld [vmem:[#allocation9 + $0x70] sm:$0xff]  }
  0x79   :  { %1045 = vmatpush3.bf16.msra.mxu0 %v1160_v9  ;;  %v140_v25 = vld [vmem:[%s139_s30] sm:$0x1]  ;;  %p149_p11 = scmp.lt.s32.totalorder %s1557_s25, 63  ;;  %p908_p12 = scmp.gt.s32.totalorder %s1557_s25, 0 }
  0x7a   :  { %1065 = vmatpush3.bf16.msra.mxu1 %v1161_v10  ;;  %1046 = vmatprep.subr.bf16.mxu0 %v1390_v1  ;;  %s1732_s24 = smov (!%p902_p10, %s143_s24), 0  ;;  %v176_v26 = vrot.slane %v140_v25, 5  ;;  %v193_v27 = vsel %vm192_vm2, %v191_v24, %v173_v23  ;;  %p156_p13 = scmp.lt.s32.totalorder %s1560_s26, 63  ;;  %v1170_v10 = vld [vmem:[#allocation10 + $0x50] sm:$0xff]   ;;  %v576_v23 = vpack.c.bf16 %v464_v21, %v464_v21  ;;  %v1183_v24 = vld [vmem:[#allocation9 + $0x78] sm:$0xff]  }
  0x7b   :  { %1066 = vmatprep.subr.bf16.mxu1 %v1390_v1  ;;  %s1734_s25 = smov (!%p149_p11, %s1557_s25), 63  ;;  %s146_s11 = scalar_lea.vmem [#allocation6], %s1732_s24 }
  0x7c   :  { %v147_v28 = vld [vmem:[%s146_s11] sm:$0x1]  ;;  %s1736_s25 = smov (!%p908_p12, %s1734_s25), 0  ;;  %v195_v30 = vsel %vm194_vm3, %v193_v27, %v176_v26  ;;  %p914_p0 = scmp.gt.s32.totalorder %s1560_s26, 0 }
  0x7d   :  { %1047 = vmatpush3.bf16.msra.mxu0 %v1162_v11  ;;  %s157_s12 = scalar_select %p156_p13, %s1560_s26, 63  ;;  %v179_v29 = vrot.slane %v147_v28, 4  ;;  %v1177_v11 = vld [vmem:[#allocation9 + $0x48] sm:$0xff]  }
  0x7e   :  { %1067 = vmatpush3.bf16.msra.mxu1 %v1163_v12  ;;  %1048 = vmatprep.subr.bf16.mxu0 %v1390_v1  ;;  %s153_s13 = scalar_lea.vmem [#allocation6], %s1736_s25  ;;  %p163_p1 = scmp.lt.s32.totalorder %s1562_s27, 63  ;;  %v1171_v12 = vld [vmem:[#allocation10 + $0x58] sm:$0xff]  }
  0x7f   :  { %1068 = vmatprep.subr.bf16.mxu1 %v1390_v1  ;;  %v154_v31 = vld [vmem:[%s153_s13] sm:$0x1]  ;;  %p920_p2 = scmp.gt.s32.totalorder %s1562_s27, 0  ;;  %s1738_s12 = smov (!%p914_p0, %s157_s12), 0  ;;  %v197_v33 = vsel %vm196_vm4, %v195_v30, %v179_v29 }
  0x80   :  { %v182_v32 = vrot.slane %v154_v31, 3  ;;  %s1740_s27 = smov (!%p163_p1, %s1562_s27), 63  ;;  %s160_s14 = scalar_lea.vmem [#allocation6], %s1738_s12  ;;  %v942_v31 = vld [vmem:[%s1708_s5 + $0x2] sm:$0x3] }
  0x81   :  { %1049 = vmatpush3.bf16.msra.mxu0 %v1164_v13  ;;  %v161_v34 = vld [vmem:[%s160_s14] sm:$0x1]  ;;  %s1742_s27 = smov (!%p920_p2, %s1740_s27), 0  ;;  %s1392_s17 = smov 96   ;;  %v1178_v13 = vld [vmem:[#allocation9 + $0x50] sm:$0xff]  }
  0x82   :  { %1069 = vmatpush3.bf16.msra.mxu1 %v1165_v14  ;;  %1050 = vmatprep.subr.bf16.mxu0 %v1390_v1  ;;  %v199_v35 = vsel %vm198_vm5, %v197_v33, %v182_v32  ;;  %v185_v36 = vrot.slane %v161_v34, 2  ;;  %s167_s15 = scalar_lea.vmem [#allocation6], %s1742_s27  ;;  %s1393_s18 = smov 32   ;;  %v1172_v14 = vld [vmem:[#allocation10 + $0x60] sm:$0xff]   ;;  %v597_v32 = vrot.slane %v942_v31, %v335_v45 }
  0x83   :  { %1070 = vmatprep.subr.bf16.mxu1 %v1390_v1  ;;  %v168_v37 = vld [vmem:[%s167_s15] sm:$0x1]  ;;  %s1394_s5 = smov [#allocation14]  }
  0x84   :  { %v201_v38 = vsel %vm200_vm6, %v199_v35, %v185_v36  ;;  %v188_v39 = vrot.slane %v168_v37, 1 }
  0x85   :  { %1051 = vmatpush3.bf16.msra.mxu0 %v1166_v15  ;;  %v1179_v15 = vld [vmem:[#allocation9 + $0x58] sm:$0xff]  }
  0x86   :  { %1071 = vmatpush3.bf16.msra.mxu1 %v1167_v16  ;;  %1076 = vmatprep.subr.bf16.mxu0 %v1390_v1  ;;  %v203_v40 = vsel %vm202_vm7, %v201_v38, %v188_v39  ;;  %v1173_v16 = vld [vmem:[#allocation10 + $0x68] sm:$0xff]  }
  0x87   :  { %1096 = vmatprep.subr.bf16.mxu1 %v1390_v1  ;;  %v204_v41 = vmax.f32 %v203_v40, 0.0 }
  0x89   :  { %1073 = vmatmul.mubr.bf16.vlgmr.msra.gmra.mrb[0].mxu1 %v316_v19  ;;  %v205_v42 = vpack.c.bf16 %v204_v41, %v204_v41  ;;  %v1181_v19 = vld [vmem:[#allocation9 + $0x68] sm:$0xff]  }
  0x8a   :  { %1112 = vmatprep.mubr.msk.bf16.mxu1 %vm1391_vm0, %v1390_v1  ;;  %1097 = vmatpush3.bf16.msra.mxu1 %v1168_v6 }
  0x8b   :  { %1053 = vmatmul.mubr.bf16.vlgmr.msra.gmra.mrb[0].mxu0 %v205_v42  ;;  %1098 = vmatprep.subr.bf16.mxu1 %v1390_v1  ;;  %v487_v42 = vrot.slane %v942_v31, %v226_v57  ;;  %v1184_v57 = vld [vmem:[#allocation12] sm:$0xff]  }
  0x8c   :  { %1092 = vmatprep.mubr.msk.bf16.mxu0 %vm1391_vm0, %v1390_v1  ;;  %1077 = vmatpush3.bf16.msra.mxu0 %v1176_v8 }
  0x8d   :  { %1078 = vmatprep.subr.bf16.mxu0 %v1390_v1 }
  0x8e   :  { %1099 = vmatpush3.bf16.msra.mxu1 %v1169_v7 }
  0x8f   :  { %1100 = vmatprep.subr.bf16.mxu1 %v1390_v1 }
  0x90   :  { %1079 = vmatpush3.bf16.msra.mxu0 %v1177_v11 }
  0x91   :  { %1080 = vmatprep.subr.bf16.mxu0 %v1390_v1 }
  0x92   :  { %1101 = vmatpush3.bf16.msra.mxu1 %v1170_v10 }
  0x93   :  { %1102 = vmatprep.subr.bf16.mxu1 %v1390_v1 }
  0x94   :  { %1081 = vmatpush3.bf16.msra.mxu0 %v1178_v13 }
  0x95   :  { %1082 = vmatprep.subr.bf16.mxu0 %v1390_v1 }
  0x96   :  { %1103 = vmatpush3.bf16.msra.mxu1 %v1171_v12 }
  0x97   :  { %1104 = vmatprep.subr.bf16.mxu1 %v1390_v1 }
  0x98   :  { %1083 = vmatpush3.bf16.msra.mxu0 %v1179_v15 }
  0x99   :  { %1084 = vmatprep.subr.bf16.mxu0 %v1390_v1 }
  0x9a   :  { %1105 = vmatpush3.bf16.msra.mxu1 %v1172_v14 }
  0x9b   :  { %1106 = vmatprep.subr.bf16.mxu1 %v1390_v1 }
  0x9c   :  { %1085 = vmatpush3.bf16.msra.mxu0 %v1180_v18 }
  0x9d   :  { %1086 = vmatprep.subr.bf16.mxu0 %v1390_v1 }
  0x9e   :  { %1107 = vmatpush3.bf16.msra.mxu1 %v1173_v16 }
  0x9f   :  { %1108 = vmatprep.subr.bf16.mxu1 %v1390_v1 }
  0xa0   :  { %1087 = vmatpush3.bf16.msra.mxu0 %v1181_v19 }
  0xa1   :  { %1088 = vmatprep.subr.bf16.mxu0 %v1390_v1 }
  0xa4   :  { %1089 = vmatpush3.bf16.msra.mxu0 %v1182_v22 }
  0xa5   :  { %1090 = vmatprep.subr.bf16.mxu0 %v1390_v1 }
  0xa8   :  { %1091 = vmatpush3.bf16.msra.mxu0 %v1183_v24 }
  0xa9   :  { %1116 = vmatprep.subr.bf16.mxu0 %v1390_v1 }
 0x15c   :  { %v419_v48 = vpop.f32.mrb[0].mxu1 }
 0x15d   :  { %v420_v49 = vadd.f32 %v419_v48, %v336_v47  ;;  %v1074_v50 = vpop.f32.mrb[1].mxu1 }
 0x15e   :  { %v422_v51 = vpop.f32.mrb[2].mxu1  ;;  %v310_v53 = vpop.f32.mrb[0].mxu0 }
 0x15f   :  { %433 = vrot.lane.b32.xlu0 %v420_v49, %s1384_s2  ;;  %v1075_v52 = vpop.f32.mrb[3].mxu1  ;;  %v1054_v54 = vpop.f32.mrb[1].mxu0  ;;  %v311_v59 = vadd.f32 %v310_v53, %v227_v58  ;;  %v1185_v58 = vld [vmem:[#allocation12 + $0x8] sm:$0xff]  }
 0x160   :  { %v313_v55 = vpop.f32.mrb[2].mxu0 }
 0x161   :  { %v1055_v56 = vpop.f32.mrb[3].mxu0  ;;  %v425_v60 = vadd.f32 %v420_v49, %v311_v59 }
 0x163   :  { %v941_v61 = vmul.f32 -1.442695, %v425_v60 }
 0x165   :  { %1192 = vpow2.f32 %v941_v61  ;;  %v1187_v61 = vld [vmem:[#allocation12 + $0x18] sm:$0xff]  }
 0x16f   :  { %v1193_v62 = vpop.eup %1192 }
 0x170   :  { %v429_v63 = vadd.f32 1.0, %v1193_v62  ;;  %v1188_v62 = vld [vmem:[#allocation12 + $0x20] sm:$0xff]  }
 0x172   :  { %1194 = vrcp.f32 %v429_v63  ;;  %v1189_v63 = vld [vmem:[#allocation12 + $0x28] sm:$0xff]  }
 0x17c   :  { %v1615_v0 = vpop.eup %1194 }
 0x17d   :  { %v443_v26 = vsub.f32 1.0, %v1615_v0 }
 0x1d1   :  { %v434_v2 = vpop.permute.xlu0 %433 }
 0x1d2   :  { %v436_v3 = vmul.f32 %v1615_v0, %v434_v2  ;;  %v1191_v2 = vld [vmem:[#allocation12 + $0x38] sm:$0xff]  }
 0x1d4   :  { %438 = vrot.lane.b32.xlu0 %v436_v3, %s1384_s2 }
 0x246   :  { %v439_v4 = vpop.permute.xlu0 %438 }
 0x247   :  { %v441_v5 = vadd.f32 %v439_v4, %v311_v59  ;;  %v1186_v59 = vld [vmem:[#allocation12 + $0x10] sm:$0xff]  }
 0x249   :  { %1196 = vtanh.f32 %v441_v5 }
 0x253   :  { %v1197_v9 = vpop.eup %1196 }
 0x254   :  { %445 = vrot.lane.b32.xlu1 %v1197_v9, %s1392_s17 }
 0x258   :  { %450 = vrot.lane.b32.xlu1 %v1574_v17, %s1393_s18  ;;  %v1174_v17 = vld [vmem:[#allocation10 + $0x70] sm:$0xff]  }
 0x259   :  { %1109 = vmatpush3.bf16.msra.mxu1 %v1174_v17 }
 0x25a   :  { %1110 = vmatprep.subr.bf16.mxu1 %v1390_v1 }
 0x25d   :  { %1111 = vmatpush3.bf16.msra.mxu1 %v1175_v20 }
 0x260   :  { %1113 = vmatmul.mubr.bf16.vlgmr.msra.gmra.mrb[4].mxu1 %v576_v23 }
 0x2c6   :  { %v446_v25 = vpop.permute.xlu1 %445 }
 0x2c7   :  { %v448_v28 = vmul.f32 %v446_v25, %v443_v26 }
 0x2ca   :  { %v451_v27 = vpop.permute.xlu1 %450 }
 0x2cb   :  { %v453_v29 = vmul.f32 %v1615_v0, %v451_v27  ;;  %v1190_v0 = vld [vmem:[#allocation12 + $0x30] sm:$0xff]  }
 0x2cd   :  { %v454_v30 = vadd.f32 %v453_v29, %v448_v28 }
 0x2cf   :  { %456 = vrot.lane.b32.xlu0 %v454_v30, %s1392_s17 }
 0x333   :  { %v680_v35 = vpop.f32.mrb[4].mxu1 }
 0x334   :  { %v681_v38 = vadd.f32 %v680_v35, %v597_v32  ;;  %v1114_v39 = vpop.f32.mrb[5].mxu1 }
 0x335   :  { %v683_v40 = vpop.f32.mrb[6].mxu1 }
 0x336   :  { %v1115_v41 = vpop.f32.mrb[7].mxu1  ;;  %694 = vrot.lane.b32.xlu1 %v681_v38, %s1384_s2 }
 0x341   :  { %v457_v33 = vpop.permute.xlu0 %456 }
 0x342   :  { %v460_v36 = vsel %vm459_vm8, %v457_v33, 0.0  ;;  %v952_v37 = vpack.c.bf16 %v457_v33, %v457_v33 }
 0x343   :  { %461 = vst [vmem:[#allocation14] sm:$0xff] %v460_v36 }
 0x344   :  { %1093 = vmatmul.mubr.msk.bf16.vlgmr.msra.gmra.mrb[4].mxu0 %vm1647_vm9, %v952_v37 }
 0x345   :  { %1132 = vmatprep.mubr.msk.bf16.mxu0 %vm1391_vm0, %v1390_v1  ;;  %1117 = vmatpush3.bf16.msra.mxu0 %v1184_v57 }
 0x346   :  { %1118 = vmatprep.subr.bf16.mxu0 %v1390_v1 }
 0x349   :  { %1119 = vmatpush3.bf16.msra.mxu0 %v1185_v58 }
 0x34a   :  { %1120 = vmatprep.subr.bf16.mxu0 %v1390_v1 }
 0x34d   :  { %1121 = vmatpush3.bf16.msra.mxu0 %v1186_v59 }
 0x34e   :  { %1122 = vmatprep.subr.bf16.mxu0 %v1390_v1 }
 0x351   :  { %1123 = vmatpush3.bf16.msra.mxu0 %v1187_v61 }
 0x352   :  { %1124 = vmatprep.subr.bf16.mxu0 %v1390_v1 }
 0x355   :  { %1125 = vmatpush3.bf16.msra.mxu0 %v1188_v62 }
 0x356   :  { %1126 = vmatprep.subr.bf16.mxu0 %v1390_v1 }
 0x359   :  { %1127 = vmatpush3.bf16.msra.mxu0 %v1189_v63 }
 0x35a   :  { %1128 = vmatprep.subr.bf16.mxu0 %v1390_v1 }
 0x35d   :  { %1129 = vmatpush3.bf16.msra.mxu0 %v1190_v0 }
 0x35e   :  { %1130 = vmatprep.subr.bf16.mxu0 %v1390_v1 }
 0x361   :  { %1131 = vmatpush3.bf16.msra.mxu0 %v1191_v2 }
 0x3a8   :  { %v695_v53 = vpop.permute.xlu1 %694 }
 0x417   :  { %v570_v43 = vpop.f32.mrb[4].mxu0 }
 0x418   :  { %v571_v45 = vadd.f32 %v570_v43, %v487_v42  ;;  %v1094_v46 = vpop.f32.mrb[5].mxu0 }
 0x419   :  { %v573_v47 = vpop.f32.mrb[6].mxu0 }
 0x41a   :  { %v686_v48 = vadd.f32 %v681_v38, %v571_v45  ;;  %v1095_v49 = vpop.f32.mrb[7].mxu0 }
 0x41c   :  { %v962_v50 = vmul.f32 -1.442695, %v686_v48 }
 0x41e   :  { %1198 = vpow2.f32 %v962_v50 }
 0x428   :  { %v1199_v51 = vpop.eup %1198 }
 0x429   :  { %v690_v52 = vadd.f32 1.0, %v1199_v51 }
 0x42b   :  { %1200 = vrcp.f32 %v690_v52 }
 0x435   :  { %v1201_v54 = vpop.eup %1200 }
 0x436   :  { %v697_v55 = vmul.f32 %v1201_v54, %v695_v53  ;;  %v704_v4 = vsub.f32 1.0, %v1201_v54 }
 0x438   :  { %699 = vrot.lane.b32.xlu0 %v697_v55, %s1384_s2  ;;  %s851_s2 = sshll.u32 %s1394_s5, 4  ;;  %s852_s2 = int_to_ptr.vmem [resolvable:$true] %s851_s2 }
 0x439   :  { %s1324_s6 = scalar_lea.vmem %s852_s2, 256  ;;  %p1329_p4 = scmp.lt.s32.totalorder %s852_s2, %s852_s2 }
 0x43a   :  { %p1325_p3 = scmp.ne.s32.totalorder %s852_s2, %s1324_s6  ;;  %p1330_p5 = scmp.lt.s32.totalorder %s1324_s6, %s1324_s6 }
 0x43c   :  { %711 = vrot.lane.b32.xlu0 %v464_v21, %s1393_s18  ;;  %p1331_p6 = por %p1330_p5, %p1329_p4 }
 0x43e   :  { %p1332_p7 = pnand %p1331_p6, %p1325_p3 }
 0x4aa   :  { %v700_v44 = vpop.permute.xlu0 %699 }
 0x4ab   :  { %v702_v56 = vadd.f32 %v700_v44, %v571_v45 }
 0x4ad   :  { %1202 = vtanh.f32 %v702_v56 }
 0x4ae   :  { %v712_v3 = vpop.permute.xlu0 %711 }
 0x4af   :  { %v714_v6 = vmul.f32 %v1201_v54, %v712_v3 }
 0x4b7   :  { %v1203_v60 = vpop.eup %1202 }
 0x4b8   :  { %706 = vrot.lane.b32.xlu1 %v1203_v60, %s1392_s17 }
 0x52a   :  { %v707_v5 = vpop.permute.xlu1 %706 }
 0x52b   :  { %v709_v7 = vmul.f32 %v707_v5, %v704_v4 }
 0x52d   :  { %v715_v8 = vadd.f32 %v714_v6, %v709_v7 }
 0x52f   :  { %717 = vrot.lane.b32.xlu1 %v715_v8, %s1392_s17 }
 0x5a1   :  { %v718_v9 = vpop.permute.xlu1 %717 }
 0x5a2   :  { %v720_v10 = vsel %vm459_vm8, %v718_v9, 0.0  ;;  %v973_v11 = vpack.c.bf16 %v718_v9, %v718_v9 }
 0x5a3   :  { %722 = vst [vmem:[#allocation14 + $0x8] sm:$0xff] %v720_v10 }
 0x5a4   :  { %1133 = vmatmul.mubr.msk.bf16.vlgmr.msra.gmra.mrb[8].mxu0 %vm1647_vm9, %v973_v11 }
 0x5a5   :  { %1335 = shalt.err (!%p1332_p7)
}
 0x5a6   :  { %s1336_s22 = scalar_lea.hbm %s1712_s9, 256 }
 0x5a7   :  { %p1337_p8 = scmp.ne.s32.totalorder %s1712_s9, %s1336_s22  ;;  %p1340_p9 = scmp.lt.u32.totalorder %s1336_s22, %s1712_s9 }
 0x5a9   :  { %p1342_p10 = pnand %p1340_p9, %p1337_p8 }
 0x5ab   :  { %1345 = shalt.err (!%p1342_p10)
}
 0x5ac   :  { %857 = dma.vmem_to_hbm [thread:$0]  %s852_s2, 256, %s1712_s9, [#allocation15], %s1381_s19, %s1381_s19, %s1382_s20  }
 0x5ad   :  { %v963_v1 = vld [vmem:[%s1710_s7] ss:$0 sm:$0xff]  ;;  %s1395_s30 = smov [#allocation13]  }
 0x5ae   :  { %s842_s11 = sshll.u32 %s1395_s30, 4  ;;  %s843_s11 = int_to_ptr.vmem [resolvable:$true] %s842_s11 }
 0x5af   :  { %s1346_s12 = scalar_lea.vmem %s843_s11, 128  ;;  %p1351_p12 = scmp.lt.s32.totalorder %s843_s11, %s843_s11 }
 0x5b0   :  { %p1347_p11 = scmp.ne.s32.totalorder %s843_s11, %s1346_s12  ;;  %p1352_p13 = scmp.lt.s32.totalorder %s1346_s12, %s1346_s12 }
 0x5b2   :  { %p1353_p0 = por %p1352_p13, %p1351_p12 }
 0x5b4   :  { %p1354_p1 = pnand %p1353_p0, %p1347_p11 }
 0x677   :  { %v829_v12 = vpop.f32.mrb[8].mxu0 }
 0x678   :  { %v830_v13 = vadd.f32 %v963_v1, %v829_v12  ;;  %v1134_v14 = vpop.f32.mrb[9].mxu0 }
 0x679   :  { %v832_v15 = vpop.f32.mrb[10].mxu0 }
 0x67a   :  { %835 = vst [vmem:[#allocation13] sm:$0xff] %v830_v13  ;;  %v1135_v16 = vpop.f32.mrb[11].mxu0 }
 0x67b   :  { %1357 = shalt.err (!%p1354_p1)
}
 0x67c   :  { %s1358_s7 = scalar_lea.hbm %s1711_s8, 128 }
 0x67d   :  { %p1359_p2 = scmp.ne.s32.totalorder %s1711_s8, %s1358_s7  ;;  %p1362_p3 = scmp.lt.u32.totalorder %s1358_s7, %s1711_s8 }
 0x67f   :  { %p1364_p4 = pnand %p1362_p3, %p1359_p2 }
 0x681   :  { %1367 = shalt.err (!%p1364_p4)
}
 0x682   :  { %845 = dma.vmem_to_hbm [thread:$0]  %s843_s11, 128, %s1711_s8, [#allocation4]  }
 0x683   :  { %1376 = dma.done.wait [#allocation4], 128  }
 0x684   :  { %1377 = vsyncadd [#allocation4], 4294967168 }
 0x685   :  { %1378 = dma.done.wait [#allocation15], 256  }
 0x686   :  { %1379 = vsyncadd [#allocation15], 4294967040 }
 0x687   :  { %864 = vsyncpa [#allocation3], 1 }
 0x688   :  { %865 = vsyncpa [#allocation8], 1 }
 0x689   :  { %866 = vsyncpa [#allocation11], 1 }
 0x68a   :  { %867 = vsyncpa [#allocation4], 1 }
 0x68b   :  { %868 = vsyncpa [#allocation15], 1 }
 0x68c   :  { %869 = vsyncpa [#allocation5], 1 }

</bundles_post_ra>
